<compile_context>
chip_gen: v7x
topology: tpu7x:2x2x1
jax: 0.10.0
libtpu: 0.0.40
codegen_flags: <defaults>
</compile_context>

<pallas_src>
import math
from functools import partial

import jax
import jax.numpy as jnp
from jax.experimental import pallas as pl
from jax.experimental.pallas import tpu as pltpu

_LANE = 128
_SUBLANE_ALIGN = 32                   # covers f32 / bf16 / int8 sublane packing
_MAX_BLOCK_BYTES = 2 * 1024 * 1024    # ~2 MiB tiles; 4 live buffers ≈ 8 MiB


def _copy_kernel(x_ref, o_ref):
    # x_ref / o_ref: one (row_tile, lanes) tile of the flat slab.
    o_ref[...] = x_ref[...]


def _pick_slab(total, itemsize):
    """Choose (rows, lanes, row_tile) for a lane-dense 2-D copy slab.

    Returns None when `total` is not a multiple of 128 (pure-reshape path).
    """
    if total % _LANE != 0:
        return None
    lanes = _LANE
    for cand in (8192, 4096, 2048, 1024, 512, 256, 128):
        if total % cand == 0 and cand * itemsize <= _MAX_BLOCK_BYTES:
            lanes = cand
            break
    rows = total // lanes
    rows_per_block = max(1, _MAX_BLOCK_BYTES // (lanes * itemsize))
    if rows <= rows_per_block:
        row_tile = rows  # whole slab in one block (block == full dims: allowed)
    else:
        row_tile = max(_SUBLANE_ALIGN,
                       (rows_per_block // _SUBLANE_ALIGN) * _SUBLANE_ALIGN)
    return rows, lanes, row_tile


@jax.jit
def _flatten_copy(x):
    n = x.shape[0]
    d = math.prod(x.shape[1:])
    total = n * d
    itemsize = jnp.dtype(x.dtype).itemsize

    slab = _pick_slab(total, itemsize)
    if slab is None:
        # Element count not lane-alignable: a view is metadata-only anyway, so
        # return the zero-copy reshape rather than padding + copying.
        return x.reshape(n, d)

    rows, lanes, row_tile = slab
    x2 = x.reshape(rows, lanes)  # metadata-only under jit (row-major == .view)

    out = pl.pallas_call(
        _copy_kernel,
        out_shape=jax.ShapeDtypeStruct((rows, lanes), x.dtype),
        grid_spec=pltpu.PrefetchScalarGridSpec(
            num_scalar_prefetch=0,
            grid=(pl.cdiv(rows, row_tile),),
            in_specs=[pl.BlockSpec((row_tile, lanes), lambda i: (i, 0))],
            out_specs=pl.BlockSpec((row_tile, lanes), lambda i: (i, 0)),
        ),
        compiler_params=pltpu.CompilerParams(
            dimension_semantics=("parallel",),       # v7x: shard steps over 2 TCs
            vmem_limit_bytes=32 * 1024 * 1024,       # headroom on v5e's 16 MiB default
        ),
    )(x2)
    return out.reshape(n, d)


def view_layer(x, dim=-1):
    """Equivalent of ViewLayer(dim).forward(x): x.view(x.size(0), dim)."""
    n = x.shape[0]
    d = math.prod(x.shape[1:])
    if dim != -1 and dim != d:
        # torch .view would raise for any other value as well.
        raise ValueError(
            f"view of size ({n}, {dim}) is incompatible with {n * d} elements")
    return _flatten_copy(x)


if __name__ == "__main__":
    key = jax.random.PRNGKey(0)
    k0, k1 = jax.random.split(key)

    # Primary test: small NCHW input as ViewLayer typically sees.
    x = jax.random.normal(k0, (2, 4, 16, 16), dtype=jnp.float32)
    y = jax.block_until_ready(view_layer(x, dim=-1))
    assert y.shape == (2, 4 * 16 * 16), y.shape
    assert bool(jnp.array_equal(y, x.reshape(2, -1))), "mismatch vs reference flatten"

    # Secondary test: large enough to exercise the multi-block (grid > 1) path.
    x2 = jax.random.normal(k1, (16, 64, 32, 32), dtype=jnp.float32)
    y2 = jax.block_until_ready(view_layer(x2))
    assert y2.shape == (16, 64 * 32 * 32), y2.shape
    assert bool(jnp.array_equal(y2, x2.reshape(16, -1))), "mismatch vs reference flatten (tiled)"

    print("KERNEL_OK")
</pallas_src>

<mosaic_0001>
module attributes {stable_mosaic.version = 11 : i64} {
  func.func @_copy_kernel(%arg0: i32, %arg1: memref<1x2048xf32, #tpu.memory_space<vmem>>, %arg2: memref<1x2048xf32, #tpu.memory_space<vmem>>) attributes {dimension_semantics = [#tpu.dimension_semantics<parallel>], iteration_bounds = array<i64: 1>, scalar_prefetch = 0 : i64, scratch_operands = 0 : i64, tpu.core_type = #tpu.core_type<tc>, window_params = [{transform_indices = @transform_0, window_bounds = array<i64: 1, 2048>}, {transform_indices = @transform_1, window_bounds = array<i64: 1, 2048>}]} {
    %c0 = arith.constant 0 : index
    %c0_0 = arith.constant 0 : index
    %0 = vector.load %arg1[%c0, %c0_0] : memref<1x2048xf32, #tpu.memory_space<vmem>>, vector<1x2048xf32>
    %c0_1 = arith.constant 0 : index
    %c0_2 = arith.constant 0 : index
    %1 = vector.load %arg2[%c0_1, %c0_2] : memref<1x2048xf32, #tpu.memory_space<vmem>>, vector<1x2048xf32>
    tpu.vector_store %arg2[%c0_1, %c0_2], %0 {strides = array<i32>} : memref<1x2048xf32, #tpu.memory_space<vmem>>, vector<1x2048xf32>,
    return
  }
  func.func @transform_0(%arg0: i32) -> (i32, i32) {
    %c0_i32 = arith.constant 0 : i32
    %c0_i32_0 = arith.constant 0 : i32
    return %arg0, %c0_i32 : i32, i32
  }
  func.func @transform_1(%arg0: i32) -> (i32, i32) {
    %c0_i32 = arith.constant 0 : i32
    %c0_i32_0 = arith.constant 0 : i32
    return %arg0, %c0_i32 : i32, i32
  }
}

</mosaic_0001>

<bundles_post_ra>
// kernel: _flatten_copy.1
= control target key start
LH: loop header
LB: loop body
LE: loop exit
PB: predicated region body
PF: predicated region fallthrough
CT: control target
= control target key end

     0   :  { %s38_s0 = inlined_call_operand.vmem [shape: f32[1,2048], index: 0, kind: input, shape index: {}]   ;;  %s39_s1 = inlined_call_operand.vmem [shape: f32[1,2048], index: 1, kind: output, shape index: {}]  }
   0x1   :  { %v8_v0 = vld [vmem:[%s38_s0] sm:$0xff]  ;;  %v9_v1 = vld [vmem:[%s38_s0 + $0x8] sm:$0xff] }
   0x2   :  { %10 = vst [vmem:[%s39_s1] sm:$0xff] %v8_v0  ;;  %11 = vst [vmem:[%s39_s1 + $0x8] sm:$0xff] %v9_v1 }

</bundles_post_ra>
